<compile_context>
chip_gen: v7x
topology: tpu7x:2x2x1
jax: 0.10.0
libtpu: 0.0.40
codegen_flags: <defaults>
</compile_context>

<pallas_src>
import functools

import jax
import jax.numpy as jnp
import numpy as np
from jax.experimental import pallas as pl
from jax.experimental.pallas import tpu as pltpu

_NEG = -1e9  # padded class lanes: s*_NEG never wins the max; exp underflows to 0


def _round_up(v, m):
    return ((v + m - 1) // m) * m


def _ldam_kernel(x_ref, tgt_ref, bm_ref, out_ref, *, s):
    _, c_pad = x_ref.shape

    x = x_ref[...].astype(jnp.float32)            # (tile_n, c_pad)
    tgt = tgt_ref[...]                            # (tile_n, 1) int32
    sm = s * bm_ref[...]                          # (tile_n, 1) f32 = s * m_list[target]

    # one-hot "scatter_" equivalent: lane iota broadcast against targets
    cls_ids = jax.lax.broadcasted_iota(jnp.int32, (1, c_pad), 1)
    is_tgt = cls_ids == tgt                       # (tile_n, c_pad) bool

    u = s * x
    # z = s * (x - batch_m * onehot): margin subtracted only on the target lane
    z = u - jnp.where(is_tgt, sm, 0.0)
    # target logit algebraically: z[target] = u[target] - s*batch_m
    u_tgt = jnp.sum(jnp.where(is_tgt, u, 0.0), axis=1, keepdims=True)

    # per-sample F.cross_entropy(z, target); mean + padded-row trim in wrapper
    z_max = jnp.max(z, axis=1, keepdims=True)
    lse = z_max + jnp.log(jnp.sum(jnp.exp(z - z_max), axis=1, keepdims=True))
    out_ref[...] = lse - (u_tgt - sm)


def ldam_loss(x, target, m_list, s=30.0, tile_n=None):
    """LDAM loss forward. x: (N, C) float, target: (N,) int, m_list: (C,) f32."""
    assert s > 0
    n, c = x.shape
    c_pad = max(128, _round_up(c, 128))           # lane-dense class axis
    itemsize = jnp.dtype(x.dtype).itemsize

    if tile_n is None:
        # Budget: double-buffered x tile + ~6 tile-sized f32 intermediates,
        # kept under ~24 MiB (fits v7x's 64 MiB VMEM; plenty on v5e/v6e).
        bytes_per_row = c_pad * (2 * itemsize + 6 * 4)
        max_rows = max(8, (24 * 1024 * 1024) // bytes_per_row)
        tile_n = min(2048, max_rows, _round_up(n, 8))
    tile_n = max(8, (tile_n // 8) * 8)
    n_pad = _round_up(n, tile_n)
    num_tiles = n_pad // tile_n

    # Class axis padded with a large negative (excluded from max / exp-sum);
    # batch axis padded with zero rows (their losses are sliced off below).
    x_p = x
    if c_pad > c:
        x_p = jnp.pad(x_p, ((0, 0), (0, c_pad - c)), constant_values=_NEG)
    if n_pad > n:
        x_p = jnp.pad(x_p, ((0, n_pad - n), (0, 0)))

    tgt_p = target.astype(jnp.int32).reshape(n, 1)
    # per-sample margin gathered in XLA: removes one full-width select and one
    # cross-lane reduce per tile inside the kernel
    bm_p = jnp.take(m_list.astype(jnp.float32), target, axis=0).reshape(n, 1)
    if n_pad > n:
        tgt_p = jnp.pad(tgt_p, ((0, n_pad - n), (0, 0)))
        bm_p = jnp.pad(bm_p, ((0, n_pad - n), (0, 0)))

    cost = pl.CostEstimate(
        flops=7 * n_pad * c_pad,
        transcendentals=n_pad * (c_pad + 1),
        bytes_accessed=x_p.size * itemsize + tgt_p.size * 4 + bm_p.size * 4 + n_pad * 4,
    )

    per_sample = pl.pallas_call(
        functools.partial(_ldam_kernel, s=float(s)),
        out_shape=jax.ShapeDtypeStruct((n_pad, 1), jnp.float32),
        grid_spec=pltpu.PrefetchScalarGridSpec(
            num_scalar_prefetch=0,
            grid=(num_tiles,),
            in_specs=[
                pl.BlockSpec((tile_n, c_pad), lambda i: (i, 0)),
                pl.BlockSpec((tile_n, 1), lambda i: (i, 0)),
                pl.BlockSpec((tile_n, 1), lambda i: (i, 0)),
            ],
            out_specs=pl.BlockSpec((tile_n, 1), lambda i: (i, 0)),
        ),
        compiler_params=pltpu.CompilerParams(
            # no carried state: each grid step owns its output block, so the
            # batch axis is truly parallel (shards across both TCs on v7x)
            dimension_semantics=("parallel",),
            vmem_limit_bytes=48 * 1024 * 1024,
        ),
        cost_estimate=cost,
    )(x_p, tgt_p, bm_p)

    # mean over the real rows; padded batch rows are simply sliced away
    return jnp.sum(per_sample[:n, 0]) * (1.0 / n)


def make_m_list(cls_num_list, max_m=0.5):
    """Deterministic parameter setup mirroring LDAMLoss.__init__."""
    m = 1.0 / np.sqrt(np.sqrt(np.asarray(cls_num_list, dtype=np.float64)))
    m = m * (max_m / np.max(m))
    return jnp.asarray(m, dtype=np.float32)


def _ldam_reference(x, target, m_list, s=30.0):
    """Pure-JAX reference mirroring the PyTorch forward (weight=None path)."""
    batch_m = jnp.take(m_list, target).reshape(-1, 1)
    onehot = jax.nn.one_hot(target, x.shape[1], dtype=x.dtype)
    z = s * (x - batch_m * onehot)
    lse = jax.nn.logsumexp(z, axis=1)
    z_tgt = jnp.take_along_axis(z, target.reshape(-1, 1), axis=1)[:, 0]
    return jnp.mean(lse - z_tgt)


if __name__ == "__main__":
    N, C = 8, 16  # batch, num classes

    key = jax.random.PRNGKey(0)
    kx, kt = jax.random.split(key)
    x = jax.random.normal(kx, (N, C), dtype=jnp.float32)
    target = jax.random.randint(kt, (N,), 0, C, dtype=jnp.int32)

    # deterministic imbalanced class-count list, as the module's __init__ expects
    cls_num_list = [1000 // (i + 1) for i in range(C)]
    m_list = make_m_list(cls_num_list, max_m=0.5)

    loss = ldam_loss(x, target, m_list, s=30.0)
    jax.block_until_ready(loss)

    ref = _ldam_reference(x, target, m_list, s=30.0)
    np.testing.assert_allclose(np.asarray(loss), np.asarray(ref), rtol=1e-4, atol=1e-4)
    print("KERNEL_OK")
</pallas_src>

<mosaic_0001>
module attributes {stable_mosaic.version = 11 : i64} {
  func.func @_ldam_kernel(%arg0: i32, %arg1: memref<8x128xf32, #tpu.memory_space<vmem>>, %arg2: memref<8x1xi32, #tpu.memory_space<vmem>>, %arg3: memref<8x1xf32, #tpu.memory_space<vmem>>, %arg4: memref<8x1xf32, #tpu.memory_space<vmem>>) attributes {dimension_semantics = [#tpu.dimension_semantics<parallel>], iteration_bounds = array<i64: 1>, scalar_prefetch = 0 : i64, scratch_operands = 0 : i64, tpu.core_type = #tpu.core_type<tc>, window_params = [{transform_indices = @transform_0, window_bounds = array<i64: 8, 128>}, {transform_indices = @transform_1, window_bounds = array<i64: 8, 1>}, {transform_indices = @transform_2, window_bounds = array<i64: 8, 1>}, {transform_indices = @transform_3, window_bounds = array<i64: 8, 1>}]} {
    %c0 = arith.constant 0 : index
    %c0_0 = arith.constant 0 : index
    %0 = vector.load %arg1[%c0, %c0_0] : memref<8x128xf32, #tpu.memory_space<vmem>>, vector<8x128xf32>
    %c0_1 = arith.constant 0 : index
    %c0_2 = arith.constant 0 : index
    %1 = vector.load %arg2[%c0_1, %c0_2] : memref<8x1xi32, #tpu.memory_space<vmem>>, vector<8x1xi32>
    %c0_3 = arith.constant 0 : index
    %c0_4 = arith.constant 0 : index
    %2 = vector.load %arg3[%c0_3, %c0_4] : memref<8x1xf32, #tpu.memory_space<vmem>>, vector<8x1xf32>
    %cst = arith.constant 3.000000e+01 : f32
    %3 = vector.broadcast %cst : f32 to vector<8x1xf32>
    %4 = arith.mulf %3, %2 : vector<8x1xf32>
    %5 = tpu.iota {dimensions = array<i32: 1>} : vector<1x128xi32>
    %6 = vector.broadcast %5 : vector<1x128xi32> to vector<8x128xi32>
    %7 = vector.broadcast %1 : vector<8x1xi32> to vector<8x128xi32>
    %8 = arith.cmpi eq, %6, %7 : vector<8x128xi32>
    %cst_5 = arith.constant 3.000000e+01 : f32
    %9 = vector.broadcast %cst_5 : f32 to vector<8x128xf32>
    %10 = arith.mulf %9, %0 : vector<8x128xf32>
    %cst_6 = arith.constant 0.000000e+00 : f32
    %11 = vector.shape_cast %4 : vector<8x1xf32> to vector<8x1xf32>
    %12 = vector.broadcast %11 : vector<8x1xf32> to vector<8x128xf32>
    %13 = vector.broadcast %cst_6 : f32 to vector<8x128xf32>
    %14 = arith.select %8, %12, %13 : vector<8x128xi1>, vector<8x128xf32>
    %15 = arith.subf %10, %14 : vector<8x128xf32>
    %cst_7 = arith.constant 0.000000e+00 : f32
    %16 = vector.broadcast %cst_7 : f32 to vector<8x128xf32>
    %17 = arith.select %8, %10, %16 : vector<8x128xi1>, vector<8x128xf32>
    %cst_8 = arith.constant dense<0.000000e+00> : vector<8xf32>
    %18 = vector.multi_reduction <add>, %17, %cst_8 [1] : vector<8x128xf32> to vector<8xf32>
    %19 = vector.shape_cast %18 : vector<8xf32> to vector<8x1xf32>
    %cst_9 = arith.constant dense<0xFF800000> : vector<8xf32>
    %20 = vector.multi_reduction <maximumf>, %15, %cst_9 [1] : vector<8x128xf32> to vector<8xf32>
    %21 = vector.shape_cast %20 : vector<8xf32> to vector<8x1xf32>
    %22 = vector.broadcast %21 : vector<8x1xf32> to vector<8x128xf32>
    %23 = arith.subf %15, %22 : vector<8x128xf32>
    %24 = math.exp %23 : vector<8x128xf32>
    %cst_10 = arith.constant dense<0.000000e+00> : vector<8xf32>
    %25 = vector.multi_reduction <add>, %24, %cst_10 [1] : vector<8x128xf32> to vector<8xf32>
    %26 = vector.shape_cast %25 : vector<8xf32> to vector<8x1xf32>
    %27 = math.log %26 : vector<8x1xf32>
    %28 = arith.addf %21, %27 : vector<8x1xf32>
    %29 = arith.subf %19, %4 : vector<8x1xf32>
    %30 = arith.subf %28, %29 : vector<8x1xf32>
    %c0_11 = arith.constant 0 : index
    %c0_12 = arith.constant 0 : index
    %31 = vector.load %arg4[%c0_11, %c0_12] : memref<8x1xf32, #tpu.memory_space<vmem>>, vector<8x1xf32>
    tpu.vector_store %arg4[%c0_11, %c0_12], %30 {strides = array<i32>} : memref<8x1xf32, #tpu.memory_space<vmem>>, vector<8x1xf32>,
    return
  }
  func.func @transform_0(%arg0: i32) -> (i32, i32) {
    %c0_i32 = arith.constant 0 : i32
    %c0_i32_0 = arith.constant 0 : i32
    return %arg0, %c0_i32 : i32, i32
  }
  func.func @transform_1(%arg0: i32) -> (i32, i32) {
    %c0_i32 = arith.constant 0 : i32
    %c0_i32_0 = arith.constant 0 : i32
    return %arg0, %c0_i32 : i32, i32
  }
  func.func @transform_2(%arg0: i32) -> (i32, i32) {
    %c0_i32 = arith.constant 0 : i32
    %c0_i32_0 = arith.constant 0 : i32
    return %arg0, %c0_i32 : i32, i32
  }
  func.func @transform_3(%arg0: i32) -> (i32, i32) {
    %c0_i32 = arith.constant 0 : i32
    %c0_i32_0 = arith.constant 0 : i32
    return %arg0, %c0_i32 : i32, i32
  }
}

</mosaic_0001>

<bundles_post_ra>
// kernel: tpu_custom_call.1
= control target key start
LH: loop header
LB: loop body
LE: loop exit
PB: predicated region body
PF: predicated region fallthrough
CT: control target
= control target key end

     0   :  { %v59_v0 = vmov 0   ;;  %v18_v4 = vlaneseq  ;;  %vm47_vm1 = vcmask 7168   ;;  %s92_s1 = inlined_call_operand.vmem [shape: s32[8,1], index: 1, kind: input, shape index: {}]   ;;  %s93_s2 = inlined_call_operand.vmem [shape: f32[8,1], index: 2, kind: input, shape index: {}]   ;;  %s94_s0 = inlined_call_operand.vmem [shape: f32[8,128], index: 0, kind: input, shape index: {}]   ;;  %s95_s3 = inlined_call_operand.vmem [shape: f32[8,1], index: 3, kind: output, shape index: {}]  }
   0x1   :  { %54 = vset.pattern.permute.xlu0 %v59_v0  ;;  %v15_v1 = vld [vmem:[%s92_s1] sm:$0xff] }
   0x2   :  { %v16_v2 = vld [vmem:[%s93_s2] sm:$0xff]  ;;  %21 = vperm.xlu0 %54, %v15_v1   ;;  %v19_v6 = vand.u32 127, %v18_v4 }
   0x3   :  { %v17_v3 = vmul.f32 30.0, %v16_v2  ;;  %v14_v5 = vld [vmem:[%s94_s0] sm:$0xff] }
   0x4   :  { %v24_v7 = vmul.f32 30.0, %v14_v5 }
   0x6   :  { %27 = vperm.xlu0 %54, %v17_v3  }
  0x81   :  { %v22_v8 = vpop.permute.xlu0 %21 }
  0x82   :  { %vm23_vm0 = vcmp.eq.s32.totalorder %v19_v6, %v22_v8 }
  0x83   :  { %v32_v9 = vsel %vm23_vm0, %v24_v7, 0.0 }
  0x84   :  { %33 = vadd.xlane.f32.xlu0 %v32_v9 }
  0x85   :  { %v28_v10 = vpop.permute.xlu0 %27 }
  0x86   :  { %v30_v11 = vsel %vm23_vm0, %v28_v10, 0.0 }
  0x87   :  { %v31_v12 = vsub.f32 %v24_v7, %v30_v11 }
  0x89   :  { %35 = vmax.xlane.f32.xlu1 %v31_v12 }
 0x111   :  { %v34_v19 = vpop.xlane.xlu0 %33 }
 0x112   :  { %v45_v21 = vsub.f32 %v34_v19, %v17_v3 }
 0x116   :  { %v36_v13 = vpop.xlane.xlu1 %35 }
 0x117   :  { %v37_v14 = vsub.f32 %v31_v12, %v36_v13 }
 0x119   :  { %v38_v15 = vmul.f32 1.442695, %v37_v14 }
 0x11b   :  { %55 = vpow2.f32 %v38_v15 }
 0x125   :  { %v56_v16 = vpop.eup %55 }
 0x126   :  { %40 = vadd.xlane.f32.xlu1 %v56_v16 }
 0x1b3   :  { %v41_v17 = vpop.xlane.xlu1 %40 }
 0x1b4   :  { %57 = vlog2.f32 %v41_v17 }
 0x1be   :  { %v58_v18 = vpop.eup %57 }
 0x1bf   :  { %v43_v20 = vmul.f32 0.6931472, %v58_v18 }
 0x1c1   :  { %v44_v22 = vadd.f32 %v43_v20, %v36_v13 }
 0x1c3   :  { %v46_v23 = vsub.f32 %v44_v22, %v45_v21 }
 0x1c5   :  { %48 = vst.msk [vmem:[%s95_s3] sm:$0xff] %vm47_vm1, %v46_v23 }

</bundles_post_ra>
